<compile_context>
chip_gen: v7x
topology: tpu7x:2x2x1
jax: 0.10.0
libtpu: 0.0.40
codegen_flags: <defaults>
</compile_context>

<pallas_src>
import functools

import jax
import jax.numpy as jnp
from jax.experimental import pallas as pl
from jax.experimental.pallas import tpu as pltpu

SUBLANE = 8      # row tiles are multiples of this
MAX_TM = 1024    # row-tile cap (per-step overhead amortized; VMEM footprint stays small)


def _round_up(x: int, m: int) -> int:
    return (x + m - 1) // m * m


def _linear_leaky(x_ref, w_ref, b_ref):
    """Linear (MXU, f32 accumulation) + bias + LeakyReLU(0.01)."""
    y = jnp.dot(x_ref[...], w_ref[...], preferred_element_type=jnp.float32)
    y = y + b_ref[...]
    return jnp.where(y >= 0, y, 0.01 * y)


def fc_stats_kernel(x_ref, w_ref, b_ref, sum_ref, m2_ref, *, m_real, tm):
    """Pass A: per-tile per-channel sum and M2 (sum of squared deviations about the
    tile mean) of LeakyReLU(x @ W + b).  Rows beyond the real row count are masked."""
    i = pl.program_id(0)
    y = _linear_leaky(x_ref, w_ref, b_ref)                      # (tm, N) f32

    row = jax.lax.broadcasted_iota(jnp.int32, y.shape, 0) + i * tm
    valid = row < m_real
    n_t = jnp.minimum(tm, m_real - i * tm).astype(jnp.float32)  # valid rows in this tile

    y_masked = jnp.where(valid, y, 0.0)
    s = jnp.sum(y_masked, axis=0, keepdims=True)                # (1, N)
    mean_t = s / n_t
    d = jnp.where(valid, y - mean_t, 0.0)
    m2 = jnp.sum(d * d, axis=0, keepdims=True)                  # (1, N)

    # Write partials into row 0 of an (8, N) block (rows 1..7 zero) so the output block
    # stays sublane-aligned; the wrapper reduces over the sublane axis afterwards.
    n = s.shape[1]
    row8 = jax.lax.broadcasted_iota(jnp.int32, (SUBLANE, n), 0)
    sum_ref[...] = jnp.where(row8 == 0, s, 0.0)
    m2_ref[...] = jnp.where(row8 == 0, m2, 0.0)


def fc_norm_kernel(x_ref, w_ref, b_ref, scale_ref, shift_ref, o_ref):
    """Pass B: recompute Linear + LeakyReLU, apply folded BatchNorm (single FMA)."""
    y = _linear_leaky(x_ref, w_ref, b_ref)
    o_ref[...] = (y * scale_ref[...] + shift_ref[...]).astype(o_ref.dtype)


def fully_connected_block(x, weight, bias, gamma, beta, eps=1e-5):
    """x: [B, L, C_in]; weight: [N, C_in] (PyTorch layout); bias/gamma/beta: [N]."""
    B, L, C_in = x.shape
    N = weight.shape[0]
    M = B * L

    # Natural-shape views / tiny host-side casts only (no padded copy of x).
    x2d = x.reshape(M, C_in)                       # metadata-only reshape
    w_t = weight.T.astype(x.dtype)                 # (C_in, N), resident in VMEM
    b_p = bias.astype(jnp.float32).reshape(1, N)
    g_f = gamma.astype(jnp.float32)
    be_f = beta.astype(jnp.float32)

    # Row tiling: multiples of 8, capped at MAX_TM; ragged last tile allowed.
    tm = min(MAX_TM, _round_up(M, SUBLANE))
    # v7x: keep >= 2 row tiles so the "parallel" grid axis can shard across both TCs.
    if M > SUBLANE and pl.cdiv(M, tm) < 2:
        tm = _round_up(pl.cdiv(M, 2), SUBLANE)
    num_tiles = pl.cdiv(M, tm)

    f32 = jnp.float32

    # ---- Pass A: per-tile partial BN statistics --------------------------------------
    part_sum, part_m2 = pl.pallas_call(
        functools.partial(fc_stats_kernel, m_real=M, tm=tm),
        out_shape=(
            jax.ShapeDtypeStruct((num_tiles * SUBLANE, N), f32),
            jax.ShapeDtypeStruct((num_tiles * SUBLANE, N), f32),
        ),
        grid_spec=pltpu.PrefetchScalarGridSpec(
            num_scalar_prefetch=0,
            grid=(num_tiles,),
            in_specs=[
                pl.BlockSpec((tm, C_in), lambda i: (i, 0)),
                pl.BlockSpec((C_in, N), lambda i: (0, 0)),   # resident weight
                pl.BlockSpec((1, N), lambda i: (0, 0)),      # resident bias
            ],
            out_specs=[
                pl.BlockSpec((SUBLANE, N), lambda i: (i, 0)),
                pl.BlockSpec((SUBLANE, N), lambda i: (i, 0)),
            ],
        ),
        compiler_params=pltpu.CompilerParams(dimension_semantics=("parallel",)),
    )(x2d, w_t, b_p)

    # ---- Combine tile statistics (Chan's parallel variance) and fold BN --------------
    tile_sums = part_sum.reshape(num_tiles, SUBLANE, N).sum(axis=1)   # (num_tiles, N)
    tile_m2 = part_m2.reshape(num_tiles, SUBLANE, N).sum(axis=1)      # (num_tiles, N)
    last_count = M - (num_tiles - 1) * tm
    counts = jnp.asarray([tm] * (num_tiles - 1) + [last_count], dtype=f32)  # (num_tiles,)

    tile_means = tile_sums / counts[:, None]
    mean = tile_sums.sum(axis=0) / M
    m2_total = tile_m2.sum(axis=0) + jnp.sum(
        counts[:, None] * (tile_means - mean) ** 2, axis=0)
    var = m2_total / M                              # biased variance (BN training mode)
    inv_std = jax.lax.rsqrt(var + eps)
    scale = (g_f * inv_std).reshape(1, N)
    shift = (be_f - mean * g_f * inv_std).reshape(1, N)

    # ---- Pass B: Linear + LeakyReLU + folded BN, data-parallel over M tiles -----------
    out2d = pl.pallas_call(
        fc_norm_kernel,
        out_shape=jax.ShapeDtypeStruct((M, N), x.dtype),
        grid_spec=pltpu.PrefetchScalarGridSpec(
            num_scalar_prefetch=0,
            grid=(num_tiles,),
            in_specs=[
                pl.BlockSpec((tm, C_in), lambda i: (i, 0)),
                pl.BlockSpec((C_in, N), lambda i: (0, 0)),   # resident weight
                pl.BlockSpec((1, N), lambda i: (0, 0)),
                pl.BlockSpec((1, N), lambda i: (0, 0)),
                pl.BlockSpec((1, N), lambda i: (0, 0)),
            ],
            out_specs=pl.BlockSpec((tm, N), lambda i: (i, 0)),
        ),
        compiler_params=pltpu.CompilerParams(dimension_semantics=("parallel",)),
    )(x2d, w_t, b_p, scale, shift)

    # TODO(synk): Dropout1d training-mode channel mask not implemented (identity / eval mode).
    return out2d.reshape(B, L, N)


def reference(x, weight, bias, gamma, beta):
    """Pure-JAX reference for correctness check."""
    y = jnp.einsum("blc,nc->bln", x, weight) + bias
    y = jnp.where(y >= 0, y, 0.01 * y)
    yf = y.reshape(-1, y.shape[-1])
    mean = jnp.mean(yf, axis=0)
    var = jnp.mean((yf - mean) ** 2, axis=0)
    y = (y - mean) / jnp.sqrt(var + 1e-5) * gamma + beta
    return y


if __name__ == "__main__":
    # Small shapes consistent with the module: input [B, L, input_size]
    B, L = 2, 8
    input_size, n_units = 32, 32

    key = jax.random.PRNGKey(0)
    kx, kw, kb, kg, kbeta = jax.random.split(key, 5)

    x = jax.random.normal(kx, (B, L, input_size), dtype=jnp.float32)

    # Deterministic parameter init (Linear: kaiming-uniform-like; BN: gamma=1, beta=0)
    bound = 1.0 / (input_size ** 0.5)
    weight = jax.random.uniform(kw, (n_units, input_size), minval=-bound, maxval=bound,
                                dtype=jnp.float32)
    bias = jax.random.uniform(kb, (n_units,), minval=-bound, maxval=bound,
                              dtype=jnp.float32)
    gamma = jnp.ones((n_units,), dtype=jnp.float32)
    beta = jnp.zeros((n_units,), dtype=jnp.float32)

    out = fully_connected_block(x, weight, bias, gamma, beta)
    out = jax.block_until_ready(out)

    ref = reference(x, weight, bias, gamma, beta)
    assert out.shape == (B, L, n_units)
    assert jnp.allclose(out, ref, atol=1e-4, rtol=1e-4), "mismatch vs reference"

    print("KERNEL_OK")
</pallas_src>

<mosaic_0001>
module attributes {stable_mosaic.version = 11 : i64} {
  func.func @fc_stats_kernel(%arg0: i32, %arg1: memref<8x32xf32, #tpu.memory_space<vmem>>, %arg2: memref<32x32xf32, #tpu.memory_space<vmem>>, %arg3: memref<1x32xf32, #tpu.memory_space<vmem>>, %arg4: memref<8x32xf32, #tpu.memory_space<vmem>>, %arg5: memref<8x32xf32, #tpu.memory_space<vmem>>) attributes {dimension_semantics = [#tpu.dimension_semantics<parallel>], iteration_bounds = array<i64: 2>, scalar_prefetch = 0 : i64, scratch_operands = 0 : i64, tpu.core_type = #tpu.core_type<tc>, window_params = [{transform_indices = @transform_0, window_bounds = array<i64: 8, 32>}, {pipeline_mode = #tpu.pipeline_mode<synchronous>, transform_indices = @transform_1, window_bounds = array<i64: 32, 32>}, {pipeline_mode = #tpu.pipeline_mode<synchronous>, transform_indices = @transform_2, window_bounds = array<i64: 1, 32>}, {transform_indices = @transform_3, window_bounds = array<i64: 8, 32>}, {transform_indices = @transform_4, window_bounds = array<i64: 8, 32>}]} {
    %c0 = arith.constant 0 : index
    %c0_0 = arith.constant 0 : index
    %0 = vector.load %arg1[%c0, %c0_0] : memref<8x32xf32, #tpu.memory_space<vmem>>, vector<8x32xf32>
    %c0_1 = arith.constant 0 : index
    %c0_2 = arith.constant 0 : index
    %1 = vector.load %arg2[%c0_1, %c0_2] : memref<32x32xf32, #tpu.memory_space<vmem>>, vector<32x32xf32>
    %cst = arith.constant dense<0.000000e+00> : vector<8x32xf32>
    %2 = tpu.matmul %0, %1, %cst {dimension_numbers = #tpu.dot_dimension_numbers<[1], [0], [0], [1], [0, 0, 1, 1], [], []>} : vector<8x32xf32>, vector<32x32xf32>, vector<8x32xf32> -> vector<8x32xf32>
    %c0_3 = arith.constant 0 : index
    %c0_4 = arith.constant 0 : index
    %3 = vector.load %arg3[%c0_3, %c0_4] : memref<1x32xf32, #tpu.memory_space<vmem>>, vector<1x32xf32>
    %4 = vector.broadcast %3 : vector<1x32xf32> to vector<8x32xf32>
    %5 = arith.addf %2, %4 : vector<8x32xf32>
    %cst_5 = arith.constant 0.000000e+00 : f32
    %6 = vector.broadcast %cst_5 : f32 to vector<8x32xf32>
    %7 = arith.cmpf oge, %5, %6 : vector<8x32xf32>
    %cst_6 = arith.constant 0.00999999977 : f32
    %8 = vector.broadcast %cst_6 : f32 to vector<8x32xf32>
    %9 = arith.mulf %8, %5 : vector<8x32xf32>
    %10 = arith.select %7, %5, %9 : vector<8x32xi1>, vector<8x32xf32>
    %11 = tpu.iota {dimensions = array<i32: 0>} : vector<8x32xi32>
    %c8_i32 = arith.constant 8 : i32
    %12 = arith.muli %arg0, %c8_i32 : i32
    %13 = vector.broadcast %12 : i32 to vector<8x32xi32>
    %14 = arith.addi %11, %13 : vector<8x32xi32>
    %c16_i32 = arith.constant 16 : i32
    %15 = vector.broadcast %c16_i32 : i32 to vector<8x32xi32>
    %16 = arith.cmpi slt, %14, %15 : vector<8x32xi32>
    %c8_i32_7 = arith.constant 8 : i32
    %17 = arith.muli %arg0, %c8_i32_7 : i32
    %c16_i32_8 = arith.constant 16 : i32
    %18 = arith.subi %c16_i32_8, %17 : i32
    %c8_i32_9 = arith.constant 8 : i32
    %19 = arith.minsi %c8_i32_9, %18 : i32
    %20 = arith.sitofp %19 : i32 to f32
    %cst_10 = arith.constant 0.000000e+00 : f32
    %21 = vector.broadcast %cst_10 : f32 to vector<8x32xf32>
    %22 = arith.select %16, %10, %21 : vector<8x32xi1>, vector<8x32xf32>
    %cst_11 = arith.constant dense<0.000000e+00> : vector<32xf32>
    %23 = vector.multi_reduction <add>, %22, %cst_11 [0] : vector<8x32xf32> to vector<32xf32>
    %24 = vector.shape_cast %23 : vector<32xf32> to vector<1x32xf32>
    %25 = vector.broadcast %20 : f32 to vector<1x32xf32>
    %26 = arith.divf %24, %25 : vector<1x32xf32>
    %27 = vector.broadcast %26 : vector<1x32xf32> to vector<8x32xf32>
    %28 = arith.subf %10, %27 : vector<8x32xf32>
    %cst_12 = arith.constant 0.000000e+00 : f32
    %29 = vector.broadcast %cst_12 : f32 to vector<8x32xf32>
    %30 = arith.select %16, %28, %29 : vector<8x32xi1>, vector<8x32xf32>
    %31 = arith.mulf %30, %30 : vector<8x32xf32>
    %cst_13 = arith.constant dense<0.000000e+00> : vector<32xf32>
    %32 = vector.multi_reduction <add>, %31, %cst_13 [0] : vector<8x32xf32> to vector<32xf32>
    %33 = vector.shape_cast %32 : vector<32xf32> to vector<1x32xf32>
    %34 = tpu.iota {dimensions = array<i32: 0>} : vector<8x32xi32>
    %c0_i32 = arith.constant 0 : i32
    %35 = vector.broadcast %c0_i32 : i32 to vector<8x32xi32>
    %36 = arith.cmpi eq, %34, %35 : vector<8x32xi32>
    %cst_14 = arith.constant 0.000000e+00 : f32
    %37 = vector.shape_cast %24 : vector<1x32xf32> to vector<1x32xf32>
    %38 = vector.broadcast %37 : vector<1x32xf32> to vector<8x32xf32>
    %39 = vector.broadcast %cst_14 : f32 to vector<8x32xf32>
    %40 = arith.select %36, %38, %39 : vector<8x32xi1>, vector<8x32xf32>
    %c0_15 = arith.constant 0 : index
    %c0_16 = arith.constant 0 : index
    %41 = vector.load %arg4[%c0_15, %c0_16] : memref<8x32xf32, #tpu.memory_space<vmem>>, vector<8x32xf32>
    tpu.vector_store %arg4[%c0_15, %c0_16], %40 {strides = array<i32>} : memref<8x32xf32, #tpu.memory_space<vmem>>, vector<8x32xf32>,
    %c0_i32_17 = arith.constant 0 : i32
    %42 = vector.broadcast %c0_i32_17 : i32 to vector<8x32xi32>
    %43 = arith.cmpi eq, %34, %42 : vector<8x32xi32>
    %cst_18 = arith.constant 0.000000e+00 : f32
    %44 = vector.shape_cast %33 : vector<1x32xf32> to vector<1x32xf32>
    %45 = vector.broadcast %44 : vector<1x32xf32> to vector<8x32xf32>
    %46 = vector.broadcast %cst_18 : f32 to vector<8x32xf32>
    %47 = arith.select %43, %45, %46 : vector<8x32xi1>, vector<8x32xf32>
    %c0_19 = arith.constant 0 : index
    %c0_20 = arith.constant 0 : index
    %48 = vector.load %arg5[%c0_19, %c0_20] : memref<8x32xf32, #tpu.memory_space<vmem>>, vector<8x32xf32>
    tpu.vector_store %arg5[%c0_19, %c0_20], %47 {strides = array<i32>} : memref<8x32xf32, #tpu.memory_space<vmem>>, vector<8x32xf32>,
    return
  }
  func.func @transform_0(%arg0: i32) -> (i32, i32) {
    %c0_i32 = arith.constant 0 : i32
    %c0_i32_0 = arith.constant 0 : i32
    return %arg0, %c0_i32 : i32, i32
  }
  func.func @transform_1(%arg0: i32) -> (i32, i32) {
    %c0_i32 = arith.constant 0 : i32
    %c0_i32_0 = arith.constant 0 : i32
    %c0_i32_1 = arith.constant 0 : i32
    return %c0_i32, %c0_i32_0 : i32, i32
  }
  func.func @transform_2(%arg0: i32) -> (i32, i32) {
    %c0_i32 = arith.constant 0 : i32
    %c0_i32_0 = arith.constant 0 : i32
    %c0_i32_1 = arith.constant 0 : i32
    return %c0_i32, %c0_i32_0 : i32, i32
  }
  func.func @transform_3(%arg0: i32) -> (i32, i32) {
    %c0_i32 = arith.constant 0 : i32
    %c0_i32_0 = arith.constant 0 : i32
    return %arg0, %c0_i32 : i32, i32
  }
  func.func @transform_4(%arg0: i32) -> (i32, i32) {
    %c0_i32 = arith.constant 0 : i32
    %c0_i32_0 = arith.constant 0 : i32
    return %arg0, %c0_i32 : i32, i32
  }
}

</mosaic_0001>

<bundles_post_ra>
// kernel: tpu_custom_call.1
= control target key start
LH: loop header
LB: loop body
LE: loop exit
PB: predicated region body
PF: predicated region fallthrough
CT: control target
= control target key end

     0   :  { %10 = vsyncpa [#allocation3], 0  ;;  %s1068_s0 = inlined_call_operand.hbm [shape: f32[16,32], index: 0, kind: input, shape index: {}]   ;;  %s1069_s1 = inlined_call_operand.hbm [shape: f32[32,32], index: 1, kind: input, shape index: {}]   ;;  %s1070_s2 = inlined_call_operand.vmem [shape: f32[1,32], index: 2, kind: input, shape index: {}]   ;;  %s1071_s3 = inlined_call_operand.hbm [shape: f32[16,32], index: 3, kind: output, shape index: {0}]   ;;  %s1072_s4 = inlined_call_operand.hbm [shape: f32[16,32], index: 4, kind: output, shape index: {1}]  }
   0x1   :  { %12 = vsyncpa [#allocation3 + $0x1], 0 }
   0x2   :  { %13 = vsyncpa [#allocation6], 0 }
   0x3   :  { %14 = vsyncpa [#allocation4], 0 }
   0x4   :  { %16 = vsyncpa [#allocation4 + $0x1], 0 }
   0x5   :  { %17 = vsyncpa [#allocation9], 0 }
   0x6   :  { %19 = vsyncpa [#allocation9 + $0x1], 0  ;;  %s815_s15 = smov 0   ;;  %s817_s16 = smov 0  }
   0x7   :  { %s819_s17 = smov 0   ;;  %s821_s18 = smov 0  }
   0x8 LB: > { %s836_s19 = sadd.s32 4294967295, %s779_s18   ;;  %s508_s20 = sadd.s32 4294967294, %s779_s18   ;;  %s779_s18 = sphi %s821_s18, %s1092_s18   ;;  %s775_s17 = sphi %s819_s17, %s1091_s17   ;;  %s771_s16 = sphi %s817_s16, %s1090_s16   ;;  %s767_s15 = sphi %s815_s15, %s1089_s15  }
   0x9   : > { %p45_p0 = scmp.ne.s32.totalorder %s771_s16, %s767_s15  ;;  %p1073_p1 = scmp.eq.s32.totalorder %s836_s19, 0 }
   0xa   : > { %p117_p3 = scmp.eq.s32.totalorder %s508_s20, 1  ;;  %p509_p5 = scmp.ge.s32.totalorder %s779_s18, 1 }
   0xb   : > { %p845_p4 = por %p1073_p1, %p45_p0  ;;  %p150_p7 = scmp.lt.s32.totalorder %s779_s18, 3 }
   0xc   : > { %p850_p6 = por %p117_p3, %p45_p0  ;;  %s781_s24 = smov [#allocation5]  }
   0xd   : > { %s1076_s21 = scalar_select %p845_p4, 1, 0 }
   0xe   : > { %s1077_s22 = scalar_select %p850_p6, 1, 0 }
   0xf   : > { %p855_p8 = pnand %p509_p5, %p150_p7  ;;  %s162_s25 = sshll.u32 %s781_s24, 4  ;;  %s859_s25 = int_to_ptr.vmem [resolvable:$true] %s162_s25 }
  0x10   : > { %s871_s27 = sadd.s32 1, %s779_s18   ;;  %s32_s28 = sadd.s32 1, %s775_s17 }
  0x11   : > { %s1078_s23 = scalar_select %p855_p8, 1, 0 }
  0x12   : > { %p560_p9 = pneg %p855_p8  ;;  %s29_s29 = ssub.s32 %s779_s18, %s871_s27 }
  0x13   : > { %s619_s6 = scalar_lea.hbm %s1069_s1, 512 }
  0x14   : > { %p866_p11 = pnand %p560_p9, %p1073_p1  ;;  %p620_p12 = scmp.ne.s32.totalorder %s1069_s1, %s619_s6 }
  0x15   : > { %p626_p5 = scmp.lt.u32.totalorder %s619_s6, %s1069_s1 }
  0x16   : > { %p621_p13 = pneg %p866_p11 }
  0x18   : > { %p622_p0 = pnand %p621_p13, %p620_p12 }
  0x1a   : > { %p623_p3 = pneg %p622_p0 }
  0x1c   : > { %p628_p7 = pnand %p626_p5, %p623_p3 }
  0x1e   : > { %631 = shalt.err (!%p628_p7)
}
  0x1f   : > { %s632_s11 = scalar_lea.vmem %s859_s25, 512  ;;  %p640_p2 = scmp.lt.s32.totalorder %s859_s25, %s859_s25 }
  0x20   : > { %p633_p9 = scmp.ne.s32.totalorder %s859_s25, %s632_s11  ;;  %p641_p6 = scmp.lt.s32.totalorder %s632_s11, %s632_s11 }
  0x22   : > { %p635_p10 = pnand %p633_p9, %p621_p13  ;;  %p642_p4 = por %p641_p6, %p640_p2 }
  0x24   : > { %p636_p1 = pneg %p635_p10 }
  0x26   : > { %p643_p8 = pnand %p642_p4, %p636_p1 }
  0x28   : > { %646 = shalt.err (!%p643_p8)
}
  0x29   : > { %s782_s12 = smov 128   ;;  %s783_s13 = smov 8  }
  0x2a   : > { %563 = dma.hbm_to_vmem [thread:$0]  (!%p866_p11), %s1069_s1, 512, %s859_s25, [#allocation6], %s782_s12, %s782_s12, %s783_s13  }
  0x2b   : > { %p30_p2 = scmp.eq.s32.totalorder %s29_s29, 0  ;;  %p39_p1 = scmp.ne.s32.totalorder %s775_s17, %s771_s16 }
  0x2c   : > { %p40_p4 = scmp.eq.s32.totalorder %s779_s18, 0  ;;  %p576_p6 = scmp.lt.s32.totalorder %s779_s18, 2 }
  0x2d   : > { %s902_s24 = scalar_select %p30_p2, %s775_s17, %s32_s28  }
  0x2e   : > { %p41_p8 = por %p40_p4, %p39_p1  ;;  %p1080_p10 = scmp.eq.s32.totalorder %s836_s19, 1 }
  0x2f   : > { %s179_s5 = sand.u32 1, %s775_s17   ;;  %s513_s6 = sshll.u32 %s779_s18, 7 }
  0x30   : > { %p906_p12 = por %p1080_p10, %p39_p1  ;;  %s512_s7 = sshll.u32 %s179_s5, 3 }
  0x31   : > { %s915_s9 = scalar_lea.hbm %s1068_s0, %s513_s6  ;;  %s183_s25 = scalar_lea.vmem [#allocation2], %s512_s7 }
  0x32   : > { %s190_s28 = sshll.u32 %s183_s25, 4  ;;  %p917_p11 = pnand %p576_p6, %p41_p8  ;;  %s921_s28 = int_to_ptr.vmem [resolvable:$true] %s190_s28 }
  0x33   : > { %s180_s10 = scalar_lea.sflag [#allocation3], %s179_s5  ;;  %s647_s11 = scalar_lea.hbm %s915_s9, 128 }
  0x34   : > { %p648_p13 = scmp.ne.s32.totalorder %s915_s9, %s647_s11  ;;  %p649_p0 = pneg %p917_p11 }
  0x35   : > { %s652_s14 = scalar_lea.hbm %s1068_s0, 256  ;;  %p653_p7 = scmp.lt.u32.totalorder %s915_s9, %s1068_s0 }
  0x36   : > { %p650_p3 = pnand %p649_p0, %p648_p13  ;;  %p654_p9 = scmp.lt.u32.totalorder %s652_s14, %s647_s11 }
  0x37   : > { %p656_p1 = scmp.lt.u32.totalorder %s647_s11, %s915_s9 }
  0x38   : > { %p651_p5 = pneg %p650_p3  ;;  %p655_p2 = por %p654_p9, %p653_p7 }
  0x3a   : > { %p657_p4 = por %p656_p1, %p655_p2 }
  0x3c   : > { %p658_p6 = pnand %p657_p4, %p651_p5 }
  0x3e   : > { %661 = shalt.err (!%p658_p6)
}
  0x3f   : > { %s662_s5 = scalar_lea.vmem %s921_s28, 128  ;;  %s784_s7 = smov [#allocation2]  }
  0x40   : > { %p663_p8 = scmp.ne.s32.totalorder %s921_s28, %s662_s5  ;;  %s667_s26 = sshll.u32 %s784_s7, 4  ;;  %s668_s26 = int_to_ptr.vmem [resolvable:$false] %s667_s26 }
  0x41   : > { %s669_s8 = scalar_lea.vmem %s668_s26, 256  ;;  %p670_p3 = scmp.lt.s32.totalorder %s921_s28, %s668_s26 }
  0x42   : > { %p665_p10 = pnand %p663_p8, %p649_p0  ;;  %p671_p7 = scmp.lt.s32.totalorder %s669_s8, %s662_s5 }
  0x44   : > { %p666_p13 = pneg %p665_p10  ;;  %p672_p9 = por %p671_p7, %p670_p3 }
  0x46   : > { %p673_p2 = pnand %p672_p9, %p666_p13 }
  0x48   : > { %676 = shalt.err (!%p673_p2)
}
  0x49   : > { %567 = dma.hbm_to_vmem [thread:$0]  (!%p917_p11), %s915_s9, 128, %s921_s28, %s180_s10  }
  0x4a   : > { %p1083_p5 = scmp.ne.s32.totalorder %s1078_s23, 0 }
  0x4b   : > { %s951_s25 = sand.u32 (!%p1083_p5), 1, %s771_s16   ;;  %p1084_p0 = scmp.ne.s32.totalorder (!%p1083_p5), %s1076_s21, 0 }
  0x4c   : > { %199 = sbr.rel (%p1083_p5) target bundleno = 374 (0x176), region = 32  ;;  %s954_s11 = sshll.u32 (!%p1083_p5), %s951_s25, 3 }
  0x4d   : > { %s202_s12 = scalar_lea.sflag (!%p1083_p5), [#allocation3], %s951_s25  ;;  %s205_s13 = scalar_lea.vmem (!%p1083_p5), [#allocation2], %s954_s11 }
  0x53   : > { %750 = dma.done.wait (%p1084_p0), %s202_s12, 128  }
  0x54   : > { %752 = vsyncadd (%p1084_p0), %s202_s12, 4294967168  ;;  %p1085_p11 = scmp.eq.s32.totalorder %s836_s19, 0 }
  0x56   : > { %754 = dma.done.wait (%p1085_p11), [#allocation6], 512   ;;  %p1086_p1 = pmov %p1085_p11 }
  0x57   : > { %v785_v0 = vmov 0.0|0.0   ;;  %vm786_vm0 = vmmov 0   ;;  %v787_v1 = vmov 0.0   ;;  %v240_v2 = vld [vmem:[#allocation5] sm:$0xff]  ;;  %v241_v3 = vld [vmem:[#allocation5 + $0x8] sm:$0xff]  ;;  %v242_v4 = vld [vmem:[#allocation5 + $0x10] sm:$0xff]  ;;  %v328_v9 = vlaneseq }
  0x58   : > { %756 = vsyncadd (%p1086_p1), [#allocation6], 4294966784  ;;  %544 = vmatprep.subr.bf16.mxu0 %v785_v0  ;;  %541 = vmatprep.mubr.msk.f32.mxu0 %vm786_vm0, %v787_v1  ;;  %v545_v5 = vpack.c.bf16 %v241_v3, %v240_v2  ;;  %v243_v6 = vld [vmem:[#allocation5 + $0x18] sm:$0xff]  ;;  %vm251_vm1 = vcmask 261120   ;;  %s521_s21 = sshll.u32 %s836_s19, 3  ;;  %s524_s10 = sshll.u32 %s836_s19, 7 }
  0x59   : > { %v548_v7 = vpack.c.bf16 %v243_v6, %v242_v4  ;;  %v239_v8 = vld [vmem:[%s205_s13] sm:$0xff]  ;;  %s334_s23 = ssub.s32 16, %s521_s21  ;;  %v968_v10 = vshrl.u32 %v328_v9, 7  ;;  %v331_v11 = vstv %s521_s21  ;;  %s231_s14 = scalar_lea.vmem [#allocation7], %s954_s11 }
  0x5a   : > { %546 = vmatpush3.bf16.msra.mxu0 %v545_v5  ;;  %p335_p4 = scmp.lt.s32.totalorder %s334_s23, 8  ;;  %v519_v12 = vld [vmem:[%s1070_s2] ss:$0 sm:$0xff]  ;;  %s383_s20 = sshll.u32 %s231_s14, 4  ;;  %s986_s20 = int_to_ptr.vmem [resolvable:$true] %s383_s20 }
  0x5b   : > { %547 = vmatprep.subr.bf16.mxu0 %v785_v0  ;;  %v332_v13 = vadd.s32 %v331_v11, %v968_v10  ;;  %vm359_vm4 = vcmp.eq.s32.totalorder %v968_v10, 0  ;;  %s984_s7 = scalar_lea.hbm %s1071_s3, %s524_s10  ;;  %s365_s26 = scalar_lea.sflag [#allocation4], %s951_s25 }
  0x5c   : > { %s1094_s23 = smov (!%p335_p4, %s334_s23), 8  ;;  %s677_s8 = scalar_lea.vmem %s986_s20, 128 }
  0x5d   : > { %s337_s29 = scvt.s32.f32 %s1094_s23  ;;  %vm333_vm3 = vcmp.lt.s32.totalorder %v332_v13, 16  ;;  %p678_p6 = scmp.ne.s32.totalorder %s986_s20, %s677_s8 }
  0x5e   : > { %549 = vmatpush3.bf16.msra.mxu0 %v548_v7  ;;  %s788_s12 = smov [#allocation7]  }
  0x5f   : > { %v346_v18 = vstv %s337_s29  ;;  %p679_p8 = pnand %p678_p6, %p906_p12  ;;  %s681_s13 = sshll.u32 %s788_s12, 4  ;;  %s682_s13 = int_to_ptr.vmem [resolvable:$false] %s681_s13 }
  0x60   : > { %617 = vrcp.f32 %v346_v18  ;;  %s683_s21 = scalar_lea.vmem %s682_s13, 256  ;;  %p684_p13 = scmp.lt.s32.totalorder %s986_s20, %s682_s13 }
  0x61   : > { %542 = vmatmul.mubr.msk.f32.vlgmr.msra.gmra.mrb[0].mxu0 %vm251_vm1, %v239_v8  ;;  %p680_p10 = pneg %p679_p8  ;;  %p685_p3 = scmp.lt.s32.totalorder %s683_s21, %s677_s8 }
  0x63   : > { %p686_p7 = por %p685_p3, %p684_p13 }
  0x65   : > { %p687_p9 = pnand %p686_p7, %p680_p10 }
  0x6a   : > { %v618_v27 = vpop.eup %617 }
 0x134   : > { %v321_v14 = vpop.f32.mrb[0].mxu0 }
 0x135   : > { %v322_v15 = vadd.f32 %v519_v12, %v321_v14  ;;  %v543_v16 = vpop.f32.mrb[1].mxu0 }
 0x137   : > { %vm325_vm2 = vcmp.ge.f32.partialorder %v322_v15, 0.0  ;;  %v326_v17 = vmul.f32 0.01, %v322_v15 }
 0x139   : > { %v327_v19 = vsel %vm325_vm2, %v322_v15, %v326_v17 }
 0x13a   : > { %v338_v20 = vsel %vm333_vm3, %v327_v19, 0.0 }
 0x13b   : > { %v339_v21 = vsel %vm251_vm1, %v338_v20, 0.0 }
 0x13c   : > { %v340_v22 = vrot.slane %v339_v21, 4 }
 0x13e   : > { %v341_v23 = vadd.f32 %v340_v22, %v339_v21 }
 0x140   : > { %v342_v24 = vrot.slane %v341_v23, 2 }
 0x142   : > { %v343_v25 = vadd.f32 %v342_v24, %v341_v23 }
 0x144   : > { %v344_v26 = vrot.slane %v343_v25, 1 }
 0x146   : > { %v345_v28 = vadd.f32 %v344_v26, %v343_v25 }
 0x148   : > { %v348_v29 = vmul.f32 %v618_v27, %v345_v28  ;;  %v360_v30 = vsel %vm359_vm4, %v345_v28, 0.0 }
 0x149   : > { %361 = vst.msk [vmem:[%s231_s14] sm:$0xff] %vm251_vm1, %v360_v30 }
 0x14a   : > { %v349_v31 = vsub.f32 %v327_v19, %v348_v29 }
 0x14b   : > { %690 = shalt.err (!%p687_p9)
}
 0x14c   : > { %s691_s23 = scalar_lea.hbm %s984_s7, 128  ;;  %s695_s29 = scalar_lea.hbm %s1071_s3, 256 }
 0x14d   : > { %p692_p2 = scmp.ne.s32.totalorder %s984_s7, %s691_s23  ;;  %p696_p11 = scmp.lt.u32.totalorder %s984_s7, %s1071_s3 }
 0x14e   : > { %p697_p1 = scmp.lt.u32.totalorder %s695_s29, %s691_s23  ;;  %p699_p6 = scmp.lt.u32.totalorder %s691_s23, %s984_s7 }
 0x14f   : > { %p693_p5 = pnand %p692_p2, %p906_p12 }
 0x150   : > { %p698_p4 = por %p697_p1, %p696_p11 }
 0x151   : > { %p694_p0 = pneg %p693_p5 }
 0x152   : > { %p700_p8 = por %p699_p6, %p698_p4 }
 0x154   : > { %p701_p10 = pnand %p700_p8, %p694_p0 }
 0x156   : > { %704 = shalt.err (!%p701_p10)
}
 0x157   : > { %556 = dma.vmem_to_hbm [thread:$0]  (%p906_p12), %s986_s20, 128, %s984_s7, %s365_s26   ;;  %v350_v32 = vsel %vm333_vm3, %v349_v31, 0.0 }
 0x158   : > { %v351_v33 = vmul.f32 %v350_v32, %v350_v32  ;;  %s238_s5 = scalar_lea.vmem [#allocation8], %s954_s11  ;;  %s1021_s20 = scalar_lea.hbm %s1072_s4, %s524_s10 }
 0x159   : > { %s396_s8 = sshll.u32 %s238_s5, 4  ;;  %s370_s7 = scalar_lea.sflag [#allocation9], %s951_s25  ;;  %s1023_s8 = int_to_ptr.vmem [resolvable:$true] %s396_s8 }
 0x15a   : > { %v352_v34 = vsel %vm251_vm1, %v351_v33, 0.0  ;;  %s705_s11 = scalar_lea.vmem %s1023_s8, 128  ;;  %s789_s19 = smov [#allocation8]  }
 0x15b   : > { %v353_v35 = vrot.slane %v352_v34, 4  ;;  %p706_p13 = scmp.ne.s32.totalorder %s1023_s8, %s705_s11  ;;  %s709_s26 = sshll.u32 %s789_s19, 4  ;;  %s710_s26 = int_to_ptr.vmem [resolvable:$false] %s709_s26 }
 0x15c   : > { %s711_s10 = scalar_lea.vmem %s710_s26, 256  ;;  %p712_p9 = scmp.lt.s32.totalorder %s1023_s8, %s710_s26 }
 0x15d   : > { %v354_v36 = vadd.f32 %v353_v35, %v352_v34  ;;  %p707_p3 = pnand %p706_p13, %p906_p12  ;;  %p713_p2 = scmp.lt.s32.totalorder %s711_s10, %s705_s11 }
 0x15f   : > { %v355_v37 = vrot.slane %v354_v36, 2  ;;  %p708_p7 = pneg %p707_p3  ;;  %p714_p5 = por %p713_p2, %p712_p9 }
 0x161   : > { %v356_v38 = vadd.f32 %v355_v37, %v354_v36  ;;  %p715_p0 = pnand %p714_p5, %p708_p7 }
 0x163   : > { %v357_v39 = vrot.slane %v356_v38, 1 }
 0x165   : > { %v358_v40 = vadd.f32 %v357_v39, %v356_v38 }
 0x167   : > { %v362_v41 = vsel %vm359_vm4, %v358_v40, 0.0 }
 0x168   : > { %363 = vst.msk [vmem:[%s238_s5] sm:$0xff] %vm251_vm1, %v362_v41 }
 0x169   : > { %718 = shalt.err (!%p715_p0)
}
 0x16a   : > { %s719_s25 = scalar_lea.hbm %s1021_s20, 128  ;;  %s723_s9 = scalar_lea.hbm %s1072_s4, 256 }
 0x16b   : > { %p720_p11 = scmp.ne.s32.totalorder %s1021_s20, %s719_s25  ;;  %p724_p6 = scmp.lt.u32.totalorder %s1021_s20, %s1072_s4 }
 0x16c   : > { %p725_p8 = scmp.lt.u32.totalorder %s723_s9, %s719_s25  ;;  %p727_p13 = scmp.lt.u32.totalorder %s719_s25, %s1021_s20 }
 0x16d   : > { %p721_p1 = pnand %p720_p11, %p906_p12 }
 0x16e   : > { %p726_p10 = por %p725_p8, %p724_p6 }
 0x16f   : > { %p722_p4 = pneg %p721_p1 }
 0x170   : > { %p728_p3 = por %p727_p13, %p726_p10 }
 0x172   : > { %p729_p7 = pnand %p728_p3, %p722_p4 }
 0x174   : > { %732 = shalt.err (!%p729_p7)
}
 0x175   : > { %557 = dma.vmem_to_hbm [thread:$0]  (%p906_p12), %s1023_s8, 128, %s1021_s20, %s370_s7  }
 0x176 PF: > { %s408_s14 = sand.u32 1, %s767_s15   ;;  %p1087_p9 = scmp.ne.s32.totalorder %s1077_s22, 0 }
 0x177   : > { %p1088_p2 = scmp.ge.s32.totalorder %s779_s18, 2  ;;  %s409_s6 = scalar_lea.sflag [#allocation4], %s408_s14 }
 0x179   : > { %p569_p5 = pnand %p1088_p2, %p1087_p9 }
 0x17b   : > { %758 = dma.done.wait (!%p569_p5), %s409_s6, 128  }
 0x17c   : > { %760 = vsyncadd (!%p569_p5), %s409_s6, 4294967168  ;;  %s418_s5 = scalar_lea.sflag [#allocation9], %s408_s14 }
 0x17d   : > { %762 = dma.done.wait (!%p569_p5), %s418_s5, 128  }
 0x17e   : > { %764 = vsyncadd (!%p569_p5), %s418_s5, 4294967168  ;;  %p22_p12 = scmp.ge.s32.totalorder %s871_s27, 4   ;;  %s1089_s15 = smov %s771_s16 }
 0x17f   : > { %s1090_s16 = smov %s775_s17  ;;  %s1091_s17 = smov %s902_s24 }
 0x180   : > { %s1092_s18 = smov %s871_s27  ;;  %24 = sbr.rel (!%p22_p12) target bundleno = 8 (0x8), region = 98 }
 0x187   :  { %423 = vsyncpa [#allocation3], 1 }
 0x188   :  { %425 = vsyncpa [#allocation3 + $0x1], 1 }
 0x189   :  { %426 = vsyncpa [#allocation6], 1 }
 0x18a   :  { %427 = vsyncpa [#allocation4], 1 }
 0x18b   :  { %429 = vsyncpa [#allocation4 + $0x1], 1 }
 0x18c   :  { %430 = vsyncpa [#allocation9], 1 }
 0x18d   :  { %432 = vsyncpa [#allocation9 + $0x1], 1 }

</bundles_post_ra>
